<compile_context>
chip_gen: v5e
topology: v5e:2x2
jax: 0.10.0
libtpu: 0.0.40
codegen_flags: <defaults>
</compile_context>

<pallas_src>
import jax
import jax.numpy as jnp
from jax import lax
from jax.experimental import pallas as pl
from jax.experimental.pallas import tpu as pltpu

BN_EPS = 1e-5
LANE = 128
VMEM_BUDGET = 20 * 1024 * 1024  # headroom under the 32 MiB default scoped VMEM


def _round_up(n, m):
    return ((n + m - 1) // m) * m


def _pad_last(a, target, value=0.0):
    extra = target - a.shape[-1]
    if extra == 0:
        return a
    cfg = [(0, 0)] * (a.ndim - 1) + [(0, extra)]
    return jnp.pad(a, cfg, constant_values=value)


def _bn_relu(h, bgb):
    """Training-mode BatchNorm1d (+affine) then ReLU on an f32 [B, tH] tile.

    Per-feature stats are independent across H tiles, so H tiling is exact.
    """
    b1 = bgb[0:1, :]
    gamma = bgb[1:2, :]
    beta = bgb[2:3, :]
    h = h + b1
    inv_b = 1.0 / h.shape[0]
    mean = jnp.sum(h, axis=0, keepdims=True) * inv_b
    centered = h - mean                                   # two-pass variance
    var = jnp.sum(centered * centered, axis=0, keepdims=True) * inv_b
    scale = gamma * lax.rsqrt(var + BN_EPS)                # EUP rsqrt slot
    return jnp.maximum(centered * scale + beta, 0.0)       # BN + ReLU


def mlp_head_single_kernel(x_ref, w1_ref, bgb_ref, w2_ref, b2_ref, o_ref):
    """Whole hidden dim in one step: no accumulator / pl.when machinery."""
    h = jnp.dot(x_ref[...], w1_ref[...], preferred_element_type=jnp.float32)
    a = _bn_relu(h, bgb_ref[...])
    o_ref[...] = (jnp.dot(a.astype(jnp.bfloat16), w2_ref[...],
                          preferred_element_type=jnp.float32)
                  + b2_ref[...]).astype(o_ref.dtype)


def mlp_head_tiled_kernel(x_ref, w1_ref, bgb_ref, w2_ref, b2_ref, o_ref):
    """H-tiled reduction, accumulated directly into the resident output block."""
    j = pl.program_id(1)

    @pl.when(j == 0)
    def _():
        o_ref[...] = jnp.zeros_like(o_ref)

    h = jnp.dot(x_ref[...], w1_ref[...], preferred_element_type=jnp.float32)
    a = _bn_relu(h, bgb_ref[...])
    o_ref[...] += jnp.dot(a.astype(jnp.bfloat16), w2_ref[...],
                          preferred_element_type=jnp.float32)

    @pl.when(j == pl.num_programs(1) - 1)
    def _():
        o_ref[...] += b2_ref[...]


def mlp_head(x, w1, b1, gamma, beta, w2, b2, *, h_tile=None, p_tile=None):
    """x: [B, C_in]; w1: [C_in, H]; b1/gamma/beta: [1, H]; w2: [H, P]; b2: [1, P]."""
    B, C_in = x.shape
    H = w1.shape[1]
    P = w2.shape[1]
    H_pad = _round_up(H, LANE)
    P_pad = _round_up(P, LANE)

    # bf16 MXU operands produced once here (halves weight DMA); f32 accumulate
    # inside the kernel. Zero-padded hidden columns stay exactly zero through
    # BN+ReLU and hit zero rows of padded w2, so numerics are unchanged.
    x_bf = x.astype(jnp.bfloat16)
    w1_p = _pad_last(w1, H_pad).astype(jnp.bfloat16)
    w2_p = _pad_last(jnp.pad(w2, ((0, H_pad - H), (0, 0))), P_pad).astype(jnp.bfloat16)

    # b1 / gamma / beta collapsed into one sublane-aligned (8, H_pad) slab so
    # per-step side traffic is a single DMA descriptor.
    bgb = jnp.zeros((8, H_pad), jnp.float32)
    bgb = bgb.at[0, :H].set(b1.reshape(-1).astype(jnp.float32))
    bgb = bgb.at[1, :H].set(gamma.reshape(-1).astype(jnp.float32))
    bgb = bgb.at[2, :H].set(beta.reshape(-1).astype(jnp.float32))

    b2_p = _pad_last(b2.reshape(1, -1).astype(jnp.float32), P_pad)

    # ---- tile selection ------------------------------------------------------
    if p_tile is None:
        if P_pad <= 512:
            p_tile = P_pad
        elif P_pad % 256 == 0:
            p_tile = 256            # 256-wide tiles for v6e/v7x 256x256 MXU
        else:
            p_tile = 128
    p_tile = min(p_tile, P_pad)
    assert P_pad % p_tile == 0
    n_p = P_pad // p_tile

    def vmem_est(ht):
        # double-buffered per-step tiles (bf16 weights, f32 bgb) + resident blocks
        per_step = 2 * (C_in * ht * 2 + ht * p_tile * 2 + 8 * ht * 4)
        resident = B * C_in * 2 + p_tile * 4 + 2 * B * p_tile * 4
        return per_step + resident

    if h_tile is None:
        # Prefer 512/256-wide H tiles (v6e/v7x MXU) that fit the scoped-VMEM
        # budget with headroom (v7x-safe); fall back to 128.
        h_tile = 128
        for t in (512, 256, 128):
            if H_pad % t == 0 and vmem_est(t) <= VMEM_BUDGET:
                h_tile = t
                break
    h_tile = min(h_tile, H_pad)
    assert H_pad % h_tile == 0
    n_h = H_pad // h_tile

    cost = pl.CostEstimate(
        flops=int(n_p * 2 * B * C_in * H_pad + 2 * B * H_pad * P_pad
                  + n_p * 8 * B * H_pad),
        transcendentals=int(n_p * H_pad),
        bytes_accessed=int(x_bf.size * 2 + n_p * w1_p.size * 2
                           + n_p * bgb.size * 4 + w2_p.size * 2
                           + b2_p.size * 4 + B * P_pad * 4),
    )

    if n_h == 1:
        # Small-H fast path: everything resident, one matmul pair per P tile.
        grid_spec = pltpu.PrefetchScalarGridSpec(
            num_scalar_prefetch=0,
            grid=(n_p,),
            in_specs=[
                pl.BlockSpec((B, C_in), lambda i: (0, 0)),        # x (resident)
                pl.BlockSpec((C_in, H_pad), lambda i: (0, 0)),    # w1 (resident)
                pl.BlockSpec((8, H_pad), lambda i: (0, 0)),       # b1/gamma/beta
                pl.BlockSpec((H_pad, p_tile), lambda i: (0, i)),  # w2 P-tile
                pl.BlockSpec((1, p_tile), lambda i: (0, i)),      # b2 P-tile
            ],
            out_specs=pl.BlockSpec((B, p_tile), lambda i: (0, i)),
        )
        kernel = mlp_head_single_kernel
        dims = ("parallel",)
    else:
        grid_spec = pltpu.PrefetchScalarGridSpec(
            num_scalar_prefetch=0,
            grid=(n_p, n_h),
            in_specs=[
                pl.BlockSpec((B, C_in), lambda i, j: (0, 0)),        # x (resident)
                pl.BlockSpec((C_in, h_tile), lambda i, j: (0, j)),   # w1 H-tile
                pl.BlockSpec((8, h_tile), lambda i, j: (0, j)),      # b1/gamma/beta
                pl.BlockSpec((h_tile, p_tile), lambda i, j: (j, i)), # w2 tile
                pl.BlockSpec((1, p_tile), lambda i, j: (0, i)),      # b2 P-tile
            ],
            # Output block index constant over j -> resident accumulator.
            out_specs=pl.BlockSpec((B, p_tile), lambda i, j: (0, i)),
        )
        kernel = mlp_head_tiled_kernel
        dims = ("parallel", "arbitrary")

    out_pad = pl.pallas_call(
        kernel,
        out_shape=jax.ShapeDtypeStruct((B, P_pad), jnp.float32),
        grid_spec=grid_spec,
        compiler_params=pltpu.CompilerParams(dimension_semantics=dims),
        cost_estimate=cost,
    )(x_bf, w1_p, bgb, w2_p, b2_p)

    return out_pad[:, :P]


def reference(x, w1, b1, gamma, beta, w2, b2):
    h = x @ w1 + b1
    mean = jnp.mean(h, axis=0, keepdims=True)
    var = jnp.mean((h - mean) ** 2, axis=0, keepdims=True)
    h = (h - mean) / jnp.sqrt(var + BN_EPS) * gamma + beta
    h = jnp.maximum(h, 0.0)
    return h @ w2 + b2


def _run_case(key, B, C_IN, HID, PROJ, **kw):
    k_x, k_w1, k_b1, k_w2, k_b2 = jax.random.split(key, 5)
    x = jax.random.normal(k_x, (B, C_IN), jnp.float32)

    # PyTorch-style uniform init; weights stored pre-transposed to [in, out].
    bound1 = 1.0 / (C_IN ** 0.5)
    w1 = jax.random.uniform(k_w1, (C_IN, HID), jnp.float32, -bound1, bound1)
    b1 = jax.random.uniform(k_b1, (1, HID), jnp.float32, -bound1, bound1)
    gamma = jnp.ones((1, HID), jnp.float32)   # BatchNorm1d default affine init
    beta = jnp.zeros((1, HID), jnp.float32)
    bound2 = 1.0 / (HID ** 0.5)
    w2 = jax.random.uniform(k_w2, (HID, PROJ), jnp.float32, -bound2, bound2)
    b2 = jax.random.uniform(k_b2, (1, PROJ), jnp.float32, -bound2, bound2)

    out = jax.block_until_ready(mlp_head(x, w1, b1, gamma, beta, w2, b2, **kw))
    ref = reference(x, w1, b1, gamma, beta, w2, b2)
    assert out.shape == (B, PROJ)
    # Tolerance relaxed vs. pure-f32 reference: matmul operands are bf16
    # (MXU-native) with f32 accumulation.
    assert jnp.allclose(out, ref, atol=5e-2, rtol=5e-2), "mismatch vs reference"


if __name__ == "__main__":
    # TODO(synk): BatchNorm running-stat tracking (eval mode) is not modeled;
    # this implements the training-mode forward of a fresh module only.
    key = jax.random.PRNGKey(0)
    k1, k2 = jax.random.split(key)

    # MLPHead(in_channels=32, mlp_hidden_size=64, projection_size=16), batch=8
    # -> H_pad=128, single-step fast path.
    _run_case(k1, 8, 32, 64, 16)

    # Larger hidden with a forced 128-wide H tile -> exercises the tiled
    # reduction path (accumulate directly into the resident output block).
    _run_case(k2, 8, 32, 256, 16, h_tile=128)

    print("KERNEL_OK")
</pallas_src>

<mosaic_0001>
module attributes {stable_mosaic.version = 11 : i64} {
  func.func @mlp_head_single_kernel(%arg0: i32, %arg1: memref<8x32xbf16, #tpu.memory_space<vmem>>, %arg2: memref<32x128xbf16, #tpu.memory_space<vmem>>, %arg3: memref<8x128xf32, #tpu.memory_space<vmem>>, %arg4: memref<128x128xbf16, #tpu.memory_space<vmem>>, %arg5: memref<1x128xf32, #tpu.memory_space<vmem>>, %arg6: memref<8x128xf32, #tpu.memory_space<vmem>>) attributes {dimension_semantics = [#tpu.dimension_semantics<parallel>], iteration_bounds = array<i64: 1>, scalar_prefetch = 0 : i64, scratch_operands = 0 : i64, tpu.core_type = #tpu.core_type<tc>, window_params = [{pipeline_mode = #tpu.pipeline_mode<synchronous>, transform_indices = @transform_0, window_bounds = array<i64: 8, 32>}, {pipeline_mode = #tpu.pipeline_mode<synchronous>, transform_indices = @transform_1, window_bounds = array<i64: 32, 128>}, {pipeline_mode = #tpu.pipeline_mode<synchronous>, transform_indices = @transform_2, window_bounds = array<i64: 8, 128>}, {transform_indices = @transform_3, window_bounds = array<i64: 128, 128>}, {transform_indices = @transform_4, window_bounds = array<i64: 1, 128>}, {transform_indices = @transform_5, window_bounds = array<i64: 8, 128>}]} {
    %c0 = arith.constant 0 : index
    %c0_0 = arith.constant 0 : index
    %0 = vector.load %arg1[%c0, %c0_0] : memref<8x32xbf16, #tpu.memory_space<vmem>>, vector<8x32xbf16>
    %c0_1 = arith.constant 0 : index
    %c0_2 = arith.constant 0 : index
    %1 = vector.load %arg2[%c0_1, %c0_2] : memref<32x128xbf16, #tpu.memory_space<vmem>>, vector<32x128xbf16>
    %cst = arith.constant dense<0.000000e+00> : vector<8x128xf32>
    %2 = tpu.matmul %0, %1, %cst {dimension_numbers = #tpu.dot_dimension_numbers<[1], [0], [0], [1], [0, 0, 1, 1], [], []>} : vector<8x32xbf16>, vector<32x128xbf16>, vector<8x128xf32> -> vector<8x128xf32>
    %c0_3 = arith.constant 0 : index
    %c0_4 = arith.constant 0 : index
    %3 = vector.load %arg3[%c0_3, %c0_4] : memref<8x128xf32, #tpu.memory_space<vmem>>, vector<8x128xf32>
    %4 = vector.extract_strided_slice %3 {offsets = [0, 0], sizes = [1, 128], strides = [1, 1]} : vector<8x128xf32> to vector<1x128xf32>
    %5 = vector.extract_strided_slice %3 {offsets = [1, 0], sizes = [1, 128], strides = [1, 1]} : vector<8x128xf32> to vector<1x128xf32>
    %6 = vector.extract_strided_slice %3 {offsets = [2, 0], sizes = [1, 128], strides = [1, 1]} : vector<8x128xf32> to vector<1x128xf32>
    %7 = vector.broadcast %4 : vector<1x128xf32> to vector<8x128xf32>
    %8 = arith.addf %2, %7 : vector<8x128xf32>
    %cst_5 = arith.constant dense<0.000000e+00> : vector<128xf32>
    %9 = vector.multi_reduction <add>, %8, %cst_5 [0] : vector<8x128xf32> to vector<128xf32>
    %10 = vector.shape_cast %9 : vector<128xf32> to vector<1x128xf32>
    %cst_6 = arith.constant 1.250000e-01 : f32
    %11 = vector.broadcast %cst_6 : f32 to vector<1x128xf32>
    %12 = arith.mulf %10, %11 : vector<1x128xf32>
    %13 = vector.broadcast %12 : vector<1x128xf32> to vector<8x128xf32>
    %14 = arith.subf %8, %13 : vector<8x128xf32>
    %15 = arith.mulf %14, %14 : vector<8x128xf32>
    %cst_7 = arith.constant dense<0.000000e+00> : vector<128xf32>
    %16 = vector.multi_reduction <add>, %15, %cst_7 [0] : vector<8x128xf32> to vector<128xf32>
    %17 = vector.shape_cast %16 : vector<128xf32> to vector<1x128xf32>
    %cst_8 = arith.constant 1.250000e-01 : f32
    %18 = vector.broadcast %cst_8 : f32 to vector<1x128xf32>
    %19 = arith.mulf %17, %18 : vector<1x128xf32>
    %cst_9 = arith.constant 9.99999974E-6 : f32
    %20 = vector.broadcast %cst_9 : f32 to vector<1x128xf32>
    %21 = arith.addf %19, %20 : vector<1x128xf32>
    %22 = math.rsqrt %21 : vector<1x128xf32>
    %23 = arith.mulf %5, %22 : vector<1x128xf32>
    %24 = vector.broadcast %23 : vector<1x128xf32> to vector<8x128xf32>
    %25 = arith.mulf %14, %24 : vector<8x128xf32>
    %26 = vector.broadcast %6 : vector<1x128xf32> to vector<8x128xf32>
    %27 = arith.addf %25, %26 : vector<8x128xf32>
    %cst_10 = arith.constant 0.000000e+00 : f32
    %28 = vector.broadcast %cst_10 : f32 to vector<8x128xf32>
    %29 = arith.maximumf %27, %28 : vector<8x128xf32>
    %30 = arith.truncf %29 : vector<8x128xf32> to vector<8x128xbf16>
    %c0_11 = arith.constant 0 : index
    %c0_12 = arith.constant 0 : index
    %31 = vector.load %arg4[%c0_11, %c0_12] : memref<128x128xbf16, #tpu.memory_space<vmem>>, vector<128x128xbf16>
    %cst_13 = arith.constant dense<0.000000e+00> : vector<8x128xf32>
    %32 = tpu.matmul %30, %31, %cst_13 {dimension_numbers = #tpu.dot_dimension_numbers<[1], [0], [0], [1], [0, 0, 1, 1], [], []>} : vector<8x128xbf16>, vector<128x128xbf16>, vector<8x128xf32> -> vector<8x128xf32>
    %c0_14 = arith.constant 0 : index
    %c0_15 = arith.constant 0 : index
    %33 = vector.load %arg5[%c0_14, %c0_15] : memref<1x128xf32, #tpu.memory_space<vmem>>, vector<1x128xf32>
    %34 = vector.broadcast %33 : vector<1x128xf32> to vector<8x128xf32>
    %35 = arith.addf %32, %34 : vector<8x128xf32>
    %c0_16 = arith.constant 0 : index
    %c0_17 = arith.constant 0 : index
    %36 = vector.load %arg6[%c0_16, %c0_17] : memref<8x128xf32, #tpu.memory_space<vmem>>, vector<8x128xf32>
    tpu.vector_store %arg6[%c0_16, %c0_17], %35 {strides = array<i32>} : memref<8x128xf32, #tpu.memory_space<vmem>>, vector<8x128xf32>,
    return
  }
  func.func @transform_0(%arg0: i32) -> (i32, i32) {
    %c0_i32 = arith.constant 0 : i32
    %c0_i32_0 = arith.constant 0 : i32
    %c0_i32_1 = arith.constant 0 : i32
    return %c0_i32, %c0_i32_0 : i32, i32
  }
  func.func @transform_1(%arg0: i32) -> (i32, i32) {
    %c0_i32 = arith.constant 0 : i32
    %c0_i32_0 = arith.constant 0 : i32
    %c0_i32_1 = arith.constant 0 : i32
    return %c0_i32, %c0_i32_0 : i32, i32
  }
  func.func @transform_2(%arg0: i32) -> (i32, i32) {
    %c0_i32 = arith.constant 0 : i32
    %c0_i32_0 = arith.constant 0 : i32
    %c0_i32_1 = arith.constant 0 : i32
    return %c0_i32, %c0_i32_0 : i32, i32
  }
  func.func @transform_3(%arg0: i32) -> (i32, i32) {
    %c0_i32 = arith.constant 0 : i32
    %c0_i32_0 = arith.constant 0 : i32
    return %c0_i32, %arg0 : i32, i32
  }
  func.func @transform_4(%arg0: i32) -> (i32, i32) {
    %c0_i32 = arith.constant 0 : i32
    %c0_i32_0 = arith.constant 0 : i32
    return %c0_i32, %arg0 : i32, i32
  }
  func.func @transform_5(%arg0: i32) -> (i32, i32) {
    %c0_i32 = arith.constant 0 : i32
    %c0_i32_0 = arith.constant 0 : i32
    return %c0_i32, %arg0 : i32, i32
  }
}

</mosaic_0001>

<bundles_post_ra>
// kernel: tpu_custom_call.1
= control target key start
LH: loop header
LB: loop body
LE: loop exit
PB: predicated region body
PF: predicated region fallthrough
CT: control target
= control target key end

     0   :  { %10 = vsyncpa [#allocation3], 0  ;;  %s496_s0 = inlined_call_operand.hbm [shape: bf16[8,32], index: 0, kind: input, shape index: {}]   ;;  %s497_s1 = inlined_call_operand.hbm [shape: bf16[32,128], index: 1, kind: input, shape index: {}]   ;;  %s498_s2 = inlined_call_operand.hbm [shape: f32[8,128], index: 2, kind: input, shape index: {}]   ;;  %s499_s3 = inlined_call_operand.hbm [shape: bf16[128,128], index: 3, kind: input, shape index: {}]   ;;  %s500_s4 = inlined_call_operand.vmem [shape: f32[1,128], index: 4, kind: input, shape index: {}]   ;;  %s501_s5 = inlined_call_operand.hbm [shape: f32[8,128], index: 5, kind: output, shape index: {}]  }
   0x1   :  { %11 = vsyncpa [#allocation6], 0 }
   0x2   :  { %12 = vsyncpa [#allocation9], 0  ;;  %s29_s20 = sshll.u32 %s497_s1, 4  ;;  %s30_s20 = int_to_ptr.hbm [resolvable:$true] %s29_s20 }
   0x3   :  { %13 = vsyncpa [#allocation4], 0  ;;  %s441_s21 = smov [#allocation5]   ;;  %s19_s25 = sshll.u32 %s496_s0, 4  ;;  %s20_s25 = int_to_ptr.hbm [resolvable:$true] %s19_s25 }
   0x4   :  { %s31_s22 = sshll.u32 %s441_s21, 4  ;;  %s442_s26 = smov 64   ;;  %s32_s22 = int_to_ptr.vmem [resolvable:$true] %s31_s22 }
   0x5   :  { %s443_s27 = smov 4   ;;  %s444_s28 = smov [#allocation2]  }
   0x6   :  { %37 = dma.hbm_to_vmem [thread:$0]  %s30_s20, 256, %s32_s22, [#allocation6], %s442_s26, %s442_s26, %s443_s27  }
   0x7   :  { %s21_s29 = sshll.u32 %s444_s28, 4  ;;  %s43_s7 = sshll.u32 %s498_s2, 4  ;;  %s22_s29 = int_to_ptr.vmem [resolvable:$true] %s21_s29  ;;  %s44_s7 = int_to_ptr.hbm [resolvable:$true] %s43_s7 }
   0x8   :  { %24 = dma.hbm_to_vmem [thread:$0]  %s20_s25, 64, %s22_s29, [#allocation3]  }
   0x9   :  { %s53_s9 = sshll.u32 %s499_s3, 4  ;;  %s445_s10 = smov [#allocation7]   ;;  %s54_s9 = int_to_ptr.hbm [resolvable:$true] %s53_s9 }
   0xa   :  { %s45_s11 = sshll.u32 %s445_s10, 4  ;;  %s446_s0 = smov [#allocation8]   ;;  %s46_s11 = int_to_ptr.vmem [resolvable:$true] %s45_s11 }
   0xb   :  { %48 = dma.hbm_to_vmem [thread:$0]  %s44_s7, 128, %s46_s11, [#allocation6]  }
   0xc   :  { %s55_s12 = sshll.u32 %s446_s0, 4  ;;  %s56_s12 = int_to_ptr.vmem [resolvable:$true] %s55_s12 }
   0xd   :  { %61 = dma.hbm_to_vmem [thread:$0]  %s54_s9, 1024, %s56_s12, [#allocation9], %s442_s26, %s442_s26, %s443_s27  }
   0xe   :  { %433 = dma.done.wait [#allocation3], 64  }
   0xf   :  { %434 = vsyncadd [#allocation3], 4294967232 }
  0x10   :  { %435 = dma.done.wait [#allocation6], 384  }
  0x11   :  { %436 = vsyncadd [#allocation6], 4294966912 }
  0x12   :  { %437 = dma.done.wait [#allocation9], 1024  }
  0x13   :  { %438 = vsyncadd [#allocation9], 4294966272  ;;  %v294_v0 = vld [vmem:[#allocation5 + $0x8] sm:$0xff]  ;;  %v293_v1 = vld [vmem:[#allocation5] sm:$0xff]  ;;  %vm100_vm0 = vcmask 261120   ;;  %s447_s13 = smov [#allocation10]  }
  0x14   :  { %110 = vmatpush.bf16.msra.mxu0 %v294_v0  ;;  %v81_v2 = vld [vmem:[#allocation2] sm:$0xf]  ;;  %v86_v3 = vld [vmem:[#allocation7] sm:$0xff]  ;;  %v301_v10 = vld [vmem:[#allocation8 + $0x30] sm:$0xff]  ;;  %s238_s14 = sshll.u32 %s447_s13, 4  ;;  %s240_s17 = sshll.u32 %s501_s5, 4  ;;  %s239_s14 = int_to_ptr.vmem [resolvable:$true] %s238_s14  ;;  %s241_s17 = int_to_ptr.hbm [resolvable:$true] %s240_s17 }
  0x15   :  { %v87_v4 = vperm.slane %v86_v3, 0  ;;  %v302_v7 = vld [vmem:[#allocation8 + $0x38] sm:$0xff]  ;;  %v300_v13 = vld [vmem:[#allocation8 + $0x28] sm:$0xff]  ;;  %v299_v16 = vld [vmem:[#allocation8 + $0x20] sm:$0xff]  ;;  %v147_v42 = vperm.slane %v86_v3, 2 }
  0x16   :  { %219 = vmatpush.bf16.msra.mxu1 %v302_v7  ;;  %v298_v19 = vld [vmem:[#allocation8 + $0x18] sm:$0xff]  ;;  %v297_v22 = vld [vmem:[#allocation8 + $0x10] sm:$0xff]  ;;  %v296_v25 = vld [vmem:[#allocation8 + $0x8] sm:$0xff] }
  0x17   :  { %v295_v28 = vld [vmem:[#allocation8] sm:$0xff] }
  0x18   :  { %111 = vmatpush.bf16.msra.mxu0 %v293_v1  ;;  %v310_v47 = vld [vmem:[%s500_s4] ss:$0 sm:$0xff] }
  0x1a   :  { %220 = vmatpush.bf16.msra.mxu1 %v301_v10 }
  0x1b   :  { %260 = vmatmul.msk.bf16.vlgmr.msra.gmra.mxu0 %vm100_vm0, %v81_v2 }
  0x1e   :  { %221 = vmatpush.bf16.msra.mxu1 %v300_v13 }
  0x22   :  { %222 = vmatpush.bf16.msra.mxu1 %v299_v16 }
  0x26   :  { %223 = vmatpush.bf16.msra.mxu1 %v298_v19 }
  0x2a   :  { %224 = vmatpush.bf16.msra.mxu1 %v297_v22 }
  0x2e   :  { %225 = vmatpush.bf16.msra.mxu1 %v296_v25 }
  0x32   :  { %226 = vmatpush.bf16.msra.mxu1 %v295_v28 }
  0x98   :  { %v113_v5 = vpop.f32.mrf.mxu0 }
  0x99   :  { %v114_v6 = vadd.f32 %v113_v5, %v87_v4 }
  0x9b   :  { %v117_v8 = vrot.slane %v114_v6, 4 }
  0x9d   :  { %v118_v9 = vadd.f32 %v117_v8, %v114_v6 }
  0x9f   :  { %v119_v11 = vrot.slane %v118_v9, 2 }
  0xa0   :  { %v115_v12 = vpop.f32.mrf.mxu0 }
  0xa1   :  { %v120_v14 = vadd.f32 %v119_v11, %v118_v9 }
  0xa3   :  { %v121_v15 = vrot.slane %v120_v14, 1 }
  0xa5   :  { %v122_v17 = vadd.f32 %v121_v15, %v120_v14 }
  0xa7   :  { %v123_v18 = vmul.f32 0.125, %v122_v17 }
  0xa9   :  { %v124_v20 = vsub.f32 %v114_v6, %v123_v18 }
  0xab   :  { %v125_v21 = vmul.f32 %v124_v20, %v124_v20 }
  0xad   :  { %v126_v23 = vrot.slane %v125_v21, 4 }
  0xaf   :  { %v127_v24 = vadd.f32 %v126_v23, %v125_v21 }
  0xb1   :  { %v128_v26 = vrot.slane %v127_v24, 2 }
  0xb3   :  { %v129_v27 = vadd.f32 %v128_v26, %v127_v24 }
  0xb5   :  { %v130_v29 = vrot.slane %v129_v27, 1 }
  0xb7   :  { %v131_v30 = vadd.f32 %v130_v29, %v129_v27 }
  0xb9   :  { %v132_v31 = vmul.f32 0.125, %v131_v30 }
  0xbb   :  { %v133_v32 = vadd.f32 1e-05, %v132_v31 }
  0xbd   :  { %311 = vrsqrt.f32 %v133_v32  ;;  %vm140_vm2 = vweird.f32 %v133_v32 }
  0xc3   :  { %v312_v33 = vpop.eup %311 }
  0xc4   :  { %v135_v34 = vmul.f32 %v312_v33, %v133_v32  ;;  %vm141_vm1 = vweird.f32 %v312_v33 }
  0xc5   :  { %vm142_vm3 = vmor %vm140_vm2, %vm141_vm1 }
  0xc6   :  { %v136_v35 = vmul.f32 %v312_v33, %v135_v34 }
  0xc8   :  { %v137_v36 = vmul.f32 0.5, %v136_v35 }
  0xca   :  { %v138_v37 = vsub.f32 1.5, %v137_v36 }
  0xcc   :  { %v139_v38 = vmul.f32 %v312_v33, %v138_v37 }
  0xce   :  { %v143_v39 = vsel %vm142_vm3, %v312_v33, %v139_v38 }
  0xcf   :  { %v144_v40 = vmul.f32 %v143_v39, %v86_v3 }
  0xd1   :  { %v145_v41 = vperm.slane %v144_v40, 1 }
  0xd3   :  { %v146_v43 = vmul.f32 %v145_v41, %v124_v20 }
  0xd5   :  { %v148_v44 = vadd.f32 %v147_v42, %v146_v43 }
  0xd7   :  { %v149_v45 = vmax.f32 %v148_v44, 0.0 }
  0xd9   :  { %v150_v46 = vpack.c.bf16 %v149_v45, %v149_v45 }
  0xdb   :  { %227 = vmatmul.bf16.vlgmr.msra.gmra.mxu1 %v150_v46 }
 0x158   :  { %v228_v48 = vpop.f32.mrf.mxu1 }
 0x159   :  { %v229_v49 = vadd.f32 %v310_v47, %v228_v48 }
 0x15b   :  { %232 = vst [vmem:[#allocation10] sm:$0xff] %v229_v49 }
 0x15c   :  { %243 = dma.vmem_to_hbm [thread:$0]  %s239_s14, 128, %s241_s17, [#allocation4]  }
 0x160   :  { %v230_v50 = vpop.f32.mrf.mxu1 }
 0x161   :  { %439 = dma.done.wait [#allocation4], 128  }
 0x162   :  { %440 = vsyncadd [#allocation4], 4294967168 }
 0x163   :  { %248 = vsyncpa [#allocation3], 1 }
 0x164   :  { %249 = vsyncpa [#allocation6], 1 }
 0x165   :  { %250 = vsyncpa [#allocation9], 1 }
 0x166   :  { %251 = vsyncpa [#allocation4], 1 }

</bundles_post_ra>
